<compile_context>
chip_gen: v7x
topology: tpu7x:2x2x1
jax: 0.10.0
libtpu: 0.0.40
codegen_flags: <defaults>
</compile_context>

<pallas_src>
import functools

import jax
import jax.numpy as jnp
from jax import lax
from jax.experimental import pallas as pl
from jax.experimental.pallas import tpu as pltpu


def _round_up(x, m):
    return ((x + m - 1) // m) * m


# ------------------------------ fused kernel --------------------------------

def _decoder_kernel(tgt_ref, emb_ref, h_ref, c_ref, w_ref, b_ref,
                    wlin_ref, blin_ref,
                    pred_ref, h_out_ref, c_out_ref,
                    xh_ref,
                    *, hidden_dim, vocab_pad):
    """One grid step == one LSTM layer.

    tgt_ref  : VMEM i32  [Bp, 1]        token ids (resident across layers)
    emb_ref  : VMEM bf16 [Vp, H]        embedding table, columns >= E are zero (resident)
    h_ref    : VMEM f32  [1, Bp, H]     previous hidden state for this layer
    c_ref    : VMEM f32  [1, Bp, H]     previous cell state for this layer
    w_ref    : VMEM bf16 [1, 2H, 4H]    [W_ih (row-padded to H); W_hh], gate order (i,f,g,o)
    b_ref    : VMEM f32  [1, 1, 4H]     b_ih + b_hh
    wlin_ref : VMEM bf16 [H, O_pad]     (resident)
    blin_ref : VMEM f32  [1, O_pad]     (resident)
    pred_ref : VMEM f32  [Bp, O_pad]    written on the last layer only
    h_out_ref: VMEM f32  [1, Bp, H]     (HBM-aliased with h_ref's buffer)
    c_out_ref: VMEM f32  [1, Bp, H]     (HBM-aliased with c_ref's buffer)
    xh_ref   : VMEM bf16 [Bp, 2H]       persistent fused [x, h] input scratch
    """
    H = hidden_dim
    Bp = tgt_ref.shape[0]
    layer = pl.program_id(0)
    last = pl.num_programs(0) - 1

    @pl.when(layer == 0)
    def _():
        # One-hot embedding gather: a single MXU pass replaces per-row dynamic slices.
        iota = lax.broadcasted_iota(jnp.int32, (Bp, vocab_pad), 1)
        onehot = (iota == tgt_ref[...]).astype(jnp.bfloat16)          # [Bp, Vp]
        x0 = jnp.dot(onehot, emb_ref[...],
                     preferred_element_type=jnp.float32)               # [Bp, H]
        # dropout == identity (eval mode)
        xh_ref[:, :H] = x0.astype(jnp.bfloat16)

    # recurrent half of the fused [x, h] input (lane-aligned boundary at H)
    xh_ref[:, H:] = h_ref[0].astype(jnp.bfloat16)

    gates = (jnp.dot(xh_ref[...], w_ref[0],
                     preferred_element_type=jnp.float32)
             + b_ref[0])                                               # [Bp, 4H] f32

    i_g = jax.nn.sigmoid(gates[:, 0 * H:1 * H])
    f_g = jax.nn.sigmoid(gates[:, 1 * H:2 * H])
    g_g = jnp.tanh(gates[:, 2 * H:3 * H])
    o_g = jax.nn.sigmoid(gates[:, 3 * H:4 * H])

    c_new = f_g * c_ref[0] + i_g * g_g
    h_new = o_g * jnp.tanh(c_new)

    h_out_ref[0] = h_new
    c_out_ref[0] = c_new
    # inter-layer dropout: identity in eval mode; feed next layer.
    xh_ref[:, :H] = h_new.astype(jnp.bfloat16)

    @pl.when(layer == last)
    def _():
        pred_ref[...] = (jnp.dot(h_new.astype(jnp.bfloat16), wlin_ref[...],
                                 preferred_element_type=jnp.float32)
                         + blin_ref[...])


# -------------------------------- wrapper ------------------------------------

def decoder_forward(params, target_p, hidden_p, cell_p):
    """Mirrors Decoder.forward (eval mode), on PRE-PADDED inputs.

    target_p : int32 [Bp, 1]               (batch padded to a multiple of 8, pad rows = 0)
    hidden_p : f32   [L, Bp, H]
    cell_p   : f32   [L, Bp, H]
    returns (prediction_padded [Bp, O_pad], hidden_p, cell_p)

    Rows B..Bp of the returned state / prediction are undefined padding and must not be read.
    """
    L, Bp, H = hidden_p.shape
    assert Bp % 8 == 0, "pad the batch to a multiple of 8 once, outside the decode loop"
    Vp = params["embedding"].shape[0]
    o_pad = params["w_lin"].shape[1]

    kernel = functools.partial(_decoder_kernel, hidden_dim=H, vocab_pad=Vp)

    # VMEM budget sized from the actual buffers (double-buffered per-layer tiles + residents).
    footprint = (
        Vp * H * 2                      # embedding table (bf16, resident)
        + 2 * (2 * H) * (4 * H) * 2     # per-layer weight tile, double-buffered (bf16)
        + 2 * (4 * H) * 4               # per-layer bias, double-buffered (f32)
        + 8 * Bp * H * 4                # h/c in+out tiles, double-buffered (f32)
        + H * o_pad * 2 + o_pad * 4     # linear weight (bf16) + bias (f32)
        + Bp * o_pad * 4                # prediction (f32)
        + Bp * 2 * H * 2                # xh scratch (bf16)
        + Bp * 4 * H * 4                # gates temporary (f32)
    )
    vmem_limit = int(min(64 << 20, max(8 << 20, 2 * footprint)))

    pred_p, h_new, c_new = pl.pallas_call(
        kernel,
        out_shape=(jax.ShapeDtypeStruct((Bp, o_pad), jnp.float32),
                   jax.ShapeDtypeStruct((L, Bp, H), jnp.float32),
                   jax.ShapeDtypeStruct((L, Bp, H), jnp.float32)),
        grid_spec=pltpu.PrefetchScalarGridSpec(
            num_scalar_prefetch=0,
            grid=(L,),
            in_specs=[
                pl.BlockSpec((Bp, 1), lambda l: (0, 0)),             # target ids (resident)
                pl.BlockSpec((Vp, H), lambda l: (0, 0)),             # embedding   (resident)
                pl.BlockSpec((1, Bp, H), lambda l: (l, 0, 0)),       # hidden[l]
                pl.BlockSpec((1, Bp, H), lambda l: (l, 0, 0)),       # cell[l]
                pl.BlockSpec((1, 2 * H, 4 * H), lambda l: (l, 0, 0)),  # w_cat[l] (pipelined)
                pl.BlockSpec((1, 1, 4 * H), lambda l: (l, 0, 0)),    # bias[l]
                pl.BlockSpec((H, o_pad), lambda l: (0, 0)),          # w_lin      (resident)
                pl.BlockSpec((1, o_pad), lambda l: (0, 0)),          # b_lin      (resident)
            ],
            out_specs=(
                pl.BlockSpec((Bp, o_pad), lambda l: (0, 0)),         # prediction (resident)
                pl.BlockSpec((1, Bp, H), lambda l: (l, 0, 0)),       # new hidden[l]
                pl.BlockSpec((1, Bp, H), lambda l: (l, 0, 0)),       # new cell[l]
            ),
            scratch_shapes=[pltpu.VMEM((Bp, 2 * H), jnp.bfloat16)],
        ),
        compiler_params=pltpu.CompilerParams(
            dimension_semantics=("arbitrary",),
            vmem_limit_bytes=vmem_limit),
        # in-place state update: hidden (arg 2) -> h_out (out 1), cell (arg 3) -> c_out (out 2)
        input_output_aliases={2: 1, 3: 2},
    )(target_p, params["embedding"], hidden_p, cell_p,
      params["w_cat"], params["b"], params["w_lin"], params["b_lin"])

    return pred_p, h_new, c_new


# --------------------------- parameter creation ------------------------------

def init_params(key, vocab_size, embed_dim, hidden_dim, output_dim, num_layers):
    assert embed_dim <= hidden_dim, "kernel packs the embed width into the hidden width"
    H = hidden_dim
    o_pad = _round_up(output_dim, 128)
    v_pad = _round_up(vocab_size, 8)

    keys = jax.random.split(key, 3 + 4 * num_layers)
    k = iter(keys)

    def u(kk, shape, scale=0.1):
        return jax.random.uniform(kk, shape, jnp.float32, -1.0, 1.0) * scale

    emb = u(next(k), (vocab_size, embed_dim))
    # Column-pad the table to H so the one-hot matmul result is already lane-sized; the matching
    # W_ih rows are zero, so the padding contributes nothing to the gates. Row-pad vocab to 8.
    emb = jnp.pad(emb, ((0, v_pad - vocab_size), (0, H - embed_dim)))
    params = {"embedding": emb.astype(jnp.bfloat16)}

    w_cat, b_cat = [], []
    for layer in range(num_layers):
        in_dim = embed_dim if layer == 0 else H
        w_ih = u(next(k), (in_dim, 4 * H))        # stored transposed vs PyTorch
        w_hh = u(next(k), (H, 4 * H))
        w_ih = jnp.pad(w_ih, ((0, H - in_dim), (0, 0)))          # zero rows for padded lanes
        w_cat.append(jnp.concatenate([w_ih, w_hh], axis=0))      # [2H, 4H]
        b_ih = u(next(k), (1, 4 * H))
        b_hh = u(next(k), (1, 4 * H))
        b_cat.append(b_ih + b_hh)                                # combined bias
    params["w_cat"] = jnp.stack(w_cat).astype(jnp.bfloat16)      # [L, 2H, 4H] bf16
    params["b"] = jnp.stack(b_cat)                               # [L, 1, 4H]  f32

    w_lin = u(next(k), (H, output_dim))
    b_lin = u(next(k), (1, output_dim))
    params["w_lin"] = jnp.pad(w_lin, ((0, 0), (0, o_pad - output_dim))).astype(jnp.bfloat16)
    params["b_lin"] = jnp.pad(b_lin, ((0, 0), (0, o_pad - output_dim)))
    return params


# --------------------------- pure-JAX reference -------------------------------

def decoder_reference(params, target, hidden, cell, *, output_dim):
    H = hidden.shape[-1]
    emb = params["embedding"].astype(jnp.float32)
    w_cat = params["w_cat"].astype(jnp.float32)
    w_lin = params["w_lin"].astype(jnp.float32)
    x = emb[target]                                              # [B, H]
    hs, cs = [], []
    for layer in range(hidden.shape[0]):
        xh = jnp.concatenate([x, hidden[layer]], axis=-1)
        gates = xh @ w_cat[layer] + params["b"][layer]
        i_g = jax.nn.sigmoid(gates[:, 0 * H:1 * H])
        f_g = jax.nn.sigmoid(gates[:, 1 * H:2 * H])
        g_g = jnp.tanh(gates[:, 2 * H:3 * H])
        o_g = jax.nn.sigmoid(gates[:, 3 * H:4 * H])
        c = f_g * cell[layer] + i_g * g_g
        h = o_g * jnp.tanh(c)
        hs.append(h)
        cs.append(c)
        x = h
    pred = x @ w_lin + params["b_lin"]
    return pred[:, :output_dim], jnp.stack(hs), jnp.stack(cs)


# ----------------------------------- main -------------------------------------

if __name__ == "__main__":
    vocab_size = 32
    embed_dim = 64
    hidden_dim = 128
    output_dim = 32
    num_layers = 2
    batch = 4

    key = jax.random.PRNGKey(0)
    kp, kt, kh, kc = jax.random.split(key, 4)

    params = init_params(kp, vocab_size, embed_dim, hidden_dim, output_dim, num_layers)

    target = jax.random.randint(kt, (batch,), 0, vocab_size, dtype=jnp.int32)
    hidden = jax.random.normal(kh, (num_layers, batch, hidden_dim), jnp.float32)
    cell = jax.random.normal(kc, (num_layers, batch, hidden_dim), jnp.float32)

    # Pad ONCE, outside the (would-be) decode loop; the state stays padded across steps.
    Bp = _round_up(max(batch, 8), 8)
    target_p = jnp.pad(target, (0, Bp - batch)).reshape(Bp, 1)
    hidden_p = jnp.pad(hidden, ((0, 0), (0, Bp - batch), (0, 0)))
    cell_p = jnp.pad(cell, ((0, 0), (0, Bp - batch), (0, 0)))

    fwd = jax.jit(decoder_forward)
    pred_p, h_new_p, c_new_p = fwd(params, target_p, hidden_p, cell_p)
    jax.block_until_ready((pred_p, h_new_p, c_new_p))

    prediction = pred_p[:batch, :output_dim]
    new_hidden = h_new_p[:, :batch, :]
    new_cell = c_new_p[:, :batch, :]

    assert prediction.shape == (batch, output_dim)
    assert new_hidden.shape == (num_layers, batch, hidden_dim)
    assert new_cell.shape == (num_layers, batch, hidden_dim)

    # correctness vs pure-JAX reference (loose tol: bf16 weights / bf16 MXU passes)
    p_ref, h_ref, c_ref = decoder_reference(params, target, hidden, cell,
                                            output_dim=output_dim)
    assert jnp.allclose(prediction, p_ref, atol=2e-2, rtol=2e-2)
    assert jnp.allclose(new_hidden, h_ref, atol=2e-2, rtol=2e-2)
    assert jnp.allclose(new_cell, c_ref, atol=2e-2, rtol=2e-2)
    assert bool(jnp.all(jnp.isfinite(prediction)))

    print("KERNEL_OK")
</pallas_src>

<mosaic_0001>
module attributes {stable_mosaic.version = 11 : i64} {
  func.func @_decoder_kernel(%arg0: i32, %arg1: memref<8x1xi32, #tpu.memory_space<vmem>>, %arg2: memref<32x128xbf16, #tpu.memory_space<vmem>>, %arg3: memref<1x8x128xf32, #tpu.memory_space<vmem>>, %arg4: memref<1x8x128xf32, #tpu.memory_space<vmem>>, %arg5: memref<1x256x512xbf16, #tpu.memory_space<vmem>>, %arg6: memref<1x1x512xf32, #tpu.memory_space<vmem>>, %arg7: memref<128x128xbf16, #tpu.memory_space<vmem>>, %arg8: memref<1x128xf32, #tpu.memory_space<vmem>>, %arg9: memref<8x128xf32, #tpu.memory_space<vmem>>, %arg10: memref<1x8x128xf32, #tpu.memory_space<vmem>>, %arg11: memref<1x8x128xf32, #tpu.memory_space<vmem>>, %arg12: memref<8x256xbf16, #tpu.memory_space<vmem>>) attributes {dimension_semantics = [#tpu.dimension_semantics<arbitrary>], iteration_bounds = array<i64: 2>, scalar_prefetch = 0 : i64, scratch_operands = 1 : i64, tpu.core_type = #tpu.core_type<tc>, window_params = [{pipeline_mode = #tpu.pipeline_mode<synchronous>, transform_indices = @transform_0, window_bounds = array<i64: 8, 1>}, {pipeline_mode = #tpu.pipeline_mode<synchronous>, transform_indices = @transform_1, window_bounds = array<i64: 32, 128>}, {transform_indices = @transform_2, window_bounds = array<i64: 1, 8, 128>}, {transform_indices = @transform_3, window_bounds = array<i64: 1, 8, 128>}, {transform_indices = @transform_4, window_bounds = array<i64: 1, 256, 512>}, {transform_indices = @transform_5, window_bounds = array<i64: 1, 1, 512>}, {pipeline_mode = #tpu.pipeline_mode<synchronous>, transform_indices = @transform_6, window_bounds = array<i64: 128, 128>}, {pipeline_mode = #tpu.pipeline_mode<synchronous>, transform_indices = @transform_7, window_bounds = array<i64: 1, 128>}, {pipeline_mode = #tpu.pipeline_mode<synchronous>, transform_indices = @transform_8, window_bounds = array<i64: 8, 128>}, {transform_indices = @transform_9, window_bounds = array<i64: 1, 8, 128>}, {transform_indices = @transform_10, window_bounds = array<i64: 1, 8, 128>}]} {
    %c0_i32 = arith.constant 0 : i32
    %0 = arith.cmpi eq, %arg0, %c0_i32 : i32
    %1 = arith.extui %0 : i1 to i32
    %c0_i32_0 = arith.constant 0 : i32
    %2 = arith.cmpi ne, %1, %c0_i32_0 : i32
    scf.if %2 {
      %53 = tpu.iota {dimensions = array<i32: 1>} : vector<8x32xi32>
      %c0_27 = arith.constant 0 : index
      %c0_28 = arith.constant 0 : index
      %54 = vector.load %arg1[%c0_27, %c0_28] : memref<8x1xi32, #tpu.memory_space<vmem>>, vector<8x1xi32>
      %55 = vector.broadcast %54 : vector<8x1xi32> to vector<8x32xi32>
      %56 = arith.cmpi eq, %53, %55 : vector<8x32xi32>
      %57 = arith.extui %56 : vector<8x32xi1> to vector<8x32xi32>
      %58 = arith.sitofp %57 : vector<8x32xi32> to vector<8x32xf32>
      %59 = arith.truncf %58 : vector<8x32xf32> to vector<8x32xbf16>
      %c0_29 = arith.constant 0 : index
      %c0_30 = arith.constant 0 : index
      %60 = vector.load %arg2[%c0_29, %c0_30] : memref<32x128xbf16, #tpu.memory_space<vmem>>, vector<32x128xbf16>
      %cst_31 = arith.constant dense<0.000000e+00> : vector<8x128xf32>
      %61 = tpu.matmul %59, %60, %cst_31 {dimension_numbers = #tpu.dot_dimension_numbers<[1], [0], [0], [1], [0, 0, 1, 1], [], []>} : vector<8x32xbf16>, vector<32x128xbf16>, vector<8x128xf32> -> vector<8x128xf32>
      %62 = arith.truncf %61 : vector<8x128xf32> to vector<8x128xbf16>
      %c0_32 = arith.constant 0 : index
      %c0_33 = arith.constant 0 : index
      %63 = vector.load %arg12[%c0_32, %c0_33] : memref<8x256xbf16, #tpu.memory_space<vmem>>, vector<8x128xbf16>
      tpu.vector_store %arg12[%c0_32, %c0_33], %62 {strides = array<i32>} : memref<8x256xbf16, #tpu.memory_space<vmem>>, vector<8x128xbf16>,
    } else {
    }
    %c0 = arith.constant 0 : index
    %c0_1 = arith.constant 0 : index
    %c0_2 = arith.constant 0 : index
    %3 = vector.load %arg3[%c0, %c0_1, %c0_2] : memref<1x8x128xf32, #tpu.memory_space<vmem>>, vector<1x8x128xf32>
    %4 = vector.shape_cast %3 : vector<1x8x128xf32> to vector<8x128xf32>
    %5 = arith.truncf %4 : vector<8x128xf32> to vector<8x128xbf16>
    %c0_3 = arith.constant 0 : index
    %c128 = arith.constant 128 : index
    %6 = vector.load %arg12[%c0_3, %c128] : memref<8x256xbf16, #tpu.memory_space<vmem>>, vector<8x128xbf16>
    tpu.vector_store %arg12[%c0_3, %c128], %5 {strides = array<i32>} : memref<8x256xbf16, #tpu.memory_space<vmem>>, vector<8x128xbf16>,
    %c0_4 = arith.constant 0 : index
    %c0_5 = arith.constant 0 : index
    %7 = vector.load %arg12[%c0_4, %c0_5] : memref<8x256xbf16, #tpu.memory_space<vmem>>, vector<8x256xbf16>
    %c0_6 = arith.constant 0 : index
    %c0_7 = arith.constant 0 : index
    %c0_8 = arith.constant 0 : index
    %8 = vector.load %arg5[%c0_6, %c0_7, %c0_8] : memref<1x256x512xbf16, #tpu.memory_space<vmem>>, vector<1x256x512xbf16>
    %9 = vector.shape_cast %8 : vector<1x256x512xbf16> to vector<256x512xbf16>
    %cst = arith.constant dense<0.000000e+00> : vector<8x512xf32>
    %10 = tpu.matmul %7, %9, %cst {dimension_numbers = #tpu.dot_dimension_numbers<[1], [0], [0], [1], [0, 0, 1, 1], [], []>} : vector<8x256xbf16>, vector<256x512xbf16>, vector<8x512xf32> -> vector<8x512xf32>
    %c0_9 = arith.constant 0 : index
    %c0_10 = arith.constant 0 : index
    %c0_11 = arith.constant 0 : index
    %11 = vector.load %arg6[%c0_9, %c0_10, %c0_11] : memref<1x1x512xf32, #tpu.memory_space<vmem>>, vector<1x1x512xf32>
    %12 = vector.shape_cast %11 : vector<1x1x512xf32> to vector<1x512xf32>
    %13 = vector.broadcast %12 : vector<1x512xf32> to vector<8x512xf32>
    %14 = arith.addf %10, %13 : vector<8x512xf32>
    %15 = vector.extract_strided_slice %14 {offsets = [0, 0], sizes = [8, 128], strides = [1, 1]} : vector<8x512xf32> to vector<8x128xf32>
    %16 = arith.negf %15 : vector<8x128xf32>
    %17 = math.exp %16 : vector<8x128xf32>
    %cst_12 = arith.constant 1.000000e+00 : f32
    %18 = vector.broadcast %cst_12 : f32 to vector<8x128xf32>
    %19 = arith.addf %18, %17 : vector<8x128xf32>
    %20 = arith.divf %18, %19 : vector<8x128xf32>
    %21 = vector.extract_strided_slice %14 {offsets = [0, 128], sizes = [8, 128], strides = [1, 1]} : vector<8x512xf32> to vector<8x128xf32>
    %22 = arith.negf %21 : vector<8x128xf32>
    %23 = math.exp %22 : vector<8x128xf32>
    %cst_13 = arith.constant 1.000000e+00 : f32
    %24 = vector.broadcast %cst_13 : f32 to vector<8x128xf32>
    %25 = arith.addf %24, %23 : vector<8x128xf32>
    %26 = arith.divf %24, %25 : vector<8x128xf32>
    %27 = vector.extract_strided_slice %14 {offsets = [0, 256], sizes = [8, 128], strides = [1, 1]} : vector<8x512xf32> to vector<8x128xf32>
    %28 = math.tanh %27 : vector<8x128xf32>
    %29 = vector.extract_strided_slice %14 {offsets = [0, 384], sizes = [8, 128], strides = [1, 1]} : vector<8x512xf32> to vector<8x128xf32>
    %30 = arith.negf %29 : vector<8x128xf32>
    %31 = math.exp %30 : vector<8x128xf32>
    %cst_14 = arith.constant 1.000000e+00 : f32
    %32 = vector.broadcast %cst_14 : f32 to vector<8x128xf32>
    %33 = arith.addf %32, %31 : vector<8x128xf32>
    %34 = arith.divf %32, %33 : vector<8x128xf32>
    %c0_15 = arith.constant 0 : index
    %c0_16 = arith.constant 0 : index
    %c0_17 = arith.constant 0 : index
    %35 = vector.load %arg4[%c0_15, %c0_16, %c0_17] : memref<1x8x128xf32, #tpu.memory_space<vmem>>, vector<1x8x128xf32>
    %36 = vector.shape_cast %35 : vector<1x8x128xf32> to vector<8x128xf32>
    %37 = arith.mulf %26, %36 : vector<8x128xf32>
    %38 = arith.mulf %20, %28 : vector<8x128xf32>
    %39 = arith.addf %37, %38 : vector<8x128xf32>
    %40 = math.tanh %39 : vector<8x128xf32>
    %41 = arith.mulf %34, %40 : vector<8x128xf32>
    %c0_18 = arith.constant 0 : index
    %c0_19 = arith.constant 0 : index
    %c0_20 = arith.constant 0 : index
    %42 = vector.load %arg10[%c0_18, %c0_19, %c0_20] : memref<1x8x128xf32, #tpu.memory_space<vmem>>, vector<1x8x128xf32>
    %43 = vector.shape_cast %42 : vector<1x8x128xf32> to vector<8x128xf32>
    %44 = vector.shape_cast %41 : vector<8x128xf32> to vector<1x8x128xf32>
    tpu.vector_store %arg10[%c0_18, %c0_19, %c0_20], %44 {strides = array<i32>} : memref<1x8x128xf32, #tpu.memory_space<vmem>>, vector<1x8x128xf32>,
    %c0_21 = arith.constant 0 : index
    %c0_22 = arith.constant 0 : index
    %c0_23 = arith.constant 0 : index
    %45 = vector.load %arg11[%c0_21, %c0_22, %c0_23] : memref<1x8x128xf32, #tpu.memory_space<vmem>>, vector<1x8x128xf32>
    %46 = vector.shape_cast %45 : vector<1x8x128xf32> to vector<8x128xf32>
    %47 = vector.shape_cast %39 : vector<8x128xf32> to vector<1x8x128xf32>
    tpu.vector_store %arg11[%c0_21, %c0_22, %c0_23], %47 {strides = array<i32>} : memref<1x8x128xf32, #tpu.memory_space<vmem>>, vector<1x8x128xf32>,
    %48 = arith.truncf %41 : vector<8x128xf32> to vector<8x128xbf16>
    %c0_24 = arith.constant 0 : index
    %c0_25 = arith.constant 0 : index
    %49 = vector.load %arg12[%c0_24, %c0_25] : memref<8x256xbf16, #tpu.memory_space<vmem>>, vector<8x128xbf16>
    tpu.vector_store %arg12[%c0_24, %c0_25], %48 {strides = array<i32>} : memref<8x256xbf16, #tpu.memory_space<vmem>>, vector<8x128xbf16>,
    %c1_i32 = arith.constant 1 : i32
    %50 = arith.cmpi eq, %arg0, %c1_i32 : i32
    %51 = arith.extui %50 : i1 to i32
    %c0_i32_26 = arith.constant 0 : i32
    %52 = arith.cmpi ne, %51, %c0_i32_26 : i32
    scf.if %52 {
      %53 = arith.truncf %41 : vector<8x128xf32> to vector<8x128xbf16>
      %c0_27 = arith.constant 0 : index
      %c0_28 = arith.constant 0 : index
      %54 = vector.load %arg7[%c0_27, %c0_28] : memref<128x128xbf16, #tpu.memory_space<vmem>>, vector<128x128xbf16>
      %cst_29 = arith.constant dense<0.000000e+00> : vector<8x128xf32>
      %55 = tpu.matmul %53, %54, %cst_29 {dimension_numbers = #tpu.dot_dimension_numbers<[1], [0], [0], [1], [0, 0, 1, 1], [], []>} : vector<8x128xbf16>, vector<128x128xbf16>, vector<8x128xf32> -> vector<8x128xf32>
      %c0_30 = arith.constant 0 : index
      %c0_31 = arith.constant 0 : index
      %56 = vector.load %arg8[%c0_30, %c0_31] : memref<1x128xf32, #tpu.memory_space<vmem>>, vector<1x128xf32>
      %57 = vector.broadcast %56 : vector<1x128xf32> to vector<8x128xf32>
      %58 = arith.addf %55, %57 : vector<8x128xf32>
      %c0_32 = arith.constant 0 : index
      %c0_33 = arith.constant 0 : index
      %59 = vector.load %arg9[%c0_32, %c0_33] : memref<8x128xf32, #tpu.memory_space<vmem>>, vector<8x128xf32>
      tpu.vector_store %arg9[%c0_32, %c0_33], %58 {strides = array<i32>} : memref<8x128xf32, #tpu.memory_space<vmem>>, vector<8x128xf32>,
    } else {
    }
    return
  }
  func.func @transform_0(%arg0: i32) -> (i32, i32) {
    %c0_i32 = arith.constant 0 : i32
    %c0_i32_0 = arith.constant 0 : i32
    %c0_i32_1 = arith.constant 0 : i32
    return %c0_i32, %c0_i32_0 : i32, i32
  }
  func.func @transform_1(%arg0: i32) -> (i32, i32) {
    %c0_i32 = arith.constant 0 : i32
    %c0_i32_0 = arith.constant 0 : i32
    %c0_i32_1 = arith.constant 0 : i32
    return %c0_i32, %c0_i32_0 : i32, i32
  }
  func.func @transform_2(%arg0: i32) -> (i32, i32, i32) {
    %c0_i32 = arith.constant 0 : i32
    %c0_i32_0 = arith.constant 0 : i32
    %c0_i32_1 = arith.constant 0 : i32
    return %arg0, %c0_i32, %c0_i32_0 : i32, i32, i32
  }
  func.func @transform_3(%arg0: i32) -> (i32, i32, i32) {
    %c0_i32 = arith.constant 0 : i32
    %c0_i32_0 = arith.constant 0 : i32
    %c0_i32_1 = arith.constant 0 : i32
    return %arg0, %c0_i32, %c0_i32_0 : i32, i32, i32
  }
  func.func @transform_4(%arg0: i32) -> (i32, i32, i32) {
    %c0_i32 = arith.constant 0 : i32
    %c0_i32_0 = arith.constant 0 : i32
    %c0_i32_1 = arith.constant 0 : i32
    return %arg0, %c0_i32, %c0_i32_0 : i32, i32, i32
  }
  func.func @transform_5(%arg0: i32) -> (i32, i32, i32) {
    %c0_i32 = arith.constant 0 : i32
    %c0_i32_0 = arith.constant 0 : i32
    %c0_i32_1 = arith.constant 0 : i32
    return %arg0, %c0_i32, %c0_i32_0 : i32, i32, i32
  }
  func.func @transform_6(%arg0: i32) -> (i32, i32) {
    %c0_i32 = arith.constant 0 : i32
    %c0_i32_0 = arith.constant 0 : i32
    %c0_i32_1 = arith.constant 0 : i32
    return %c0_i32, %c0_i32_0 : i32, i32
  }
  func.func @transform_7(%arg0: i32) -> (i32, i32) {
    %c0_i32 = arith.constant 0 : i32
    %c0_i32_0 = arith.constant 0 : i32
    %c0_i32_1 = arith.constant 0 : i32
    return %c0_i32, %c0_i32_0 : i32, i32
  }
  func.func @transform_8(%arg0: i32) -> (i32, i32) {
    %c0_i32 = arith.constant 0 : i32
    %c0_i32_0 = arith.constant 0 : i32
    %c0_i32_1 = arith.constant 0 : i32
    return %c0_i32, %c0_i32_0 : i32, i32
  }
  func.func @transform_9(%arg0: i32) -> (i32, i32, i32) {
    %c0_i32 = arith.constant 0 : i32
    %c0_i32_0 = arith.constant 0 : i32
    %c0_i32_1 = arith.constant 0 : i32
    return %arg0, %c0_i32, %c0_i32_0 : i32, i32, i32
  }
  func.func @transform_10(%arg0: i32) -> (i32, i32, i32) {
    %c0_i32 = arith.constant 0 : i32
    %c0_i32_0 = arith.constant 0 : i32
    %c0_i32_1 = arith.constant 0 : i32
    return %arg0, %c0_i32, %c0_i32_0 : i32, i32, i32
  }
}

</mosaic_0001>

<bundles_post_ra>
// kernel: decoder_forward.1
= control target key start
LH: loop header
LB: loop body
LE: loop exit
PB: predicated region body
PF: predicated region fallthrough
CT: control target
= control target key end

     0   :  { %s2461_s0 = inlined_call_operand.vmem [shape: s32[8,1], index: 0, kind: input, shape index: {}]   ;;  %s2462_s1 = inlined_call_operand.vmem [shape: bf16[32,128], index: 1, kind: input, shape index: {}]   ;;  %s2463_s2 = inlined_call_operand.hbm [shape: f32[2,8,128], index: 2, kind: input, shape index: {}, may-alias: {2,9}]   ;;  %s2464_s3 = inlined_call_operand.hbm [shape: f32[2,8,128], index: 3, kind: input, shape index: {}, may-alias: {3,10}]   ;;  %s2465_s4 = inlined_call_operand.hbm [shape: bf16[2,256,512], index: 4, kind: input, shape index: {}]   ;;  %s2466_s5 = inlined_call_operand.vmem [shape: f32[2,1,512], index: 5, kind: input, shape index: {}]   ;;  %s2467_s6 = inlined_call_operand.vmem [shape: bf16[128,128], index: 6, kind: input, shape index: {}]   ;;  %s2468_s7 = inlined_call_operand.vmem [shape: f32[1,128], index: 7, kind: input, shape index: {}]   ;;  %s2469_s8 = inlined_call_operand.hbm [shape: f32[8,128], index: 8, kind: output, shape index: {0}]   ;;  %s2470_s9 = inlined_call_operand.hbm [shape: f32[2,8,128], index: 9, kind: output, shape index: {1}, may-alias: {2,9}]   ;;  %s2471_s10 = inlined_call_operand.hbm [shape: f32[2,8,128], index: 10, kind: output, shape index: {2}, may-alias: {3,10}]  }
   0x1   :  { %2484 = sst [smem:[#allocation21_spill]] %s2464_s3 }
   0x2   :  { %2485 = sst [smem:[#allocation22_spill]] %s2469_s8 }
   0x3   :  { %2486 = sst [smem:[#allocation23_spill]] %s2471_s10 }
   0x4   :  { %16 = vsyncpa [#allocation4], 0 }
   0x5   :  { %18 = vsyncpa [#allocation4 + $0x1], 0 }
   0x6   :  { %19 = vsyncpa [#allocation7], 0 }
   0x7   :  { %21 = vsyncpa [#allocation7 + $0x1], 0 }
   0x8   :  { %22 = vsyncpa [#allocation5], 0 }
   0x9   :  { %23 = vsyncpa [#allocation11], 0 }
   0xa   :  { %25 = vsyncpa [#allocation11 + $0x1], 0  ;;  %s2041_s13 = smov 0   ;;  %s2043_s14 = smov 0  }
   0xb   :  { %s2045_s15 = smov 0   ;;  %s2047_s16 = smov 0  }
   0xc LB: > { %2487 = sst [smem:[#allocation17_spill]] %s1967_s15  ;;  %s2060_s17 = sadd.s32 4294967295, %s1971_s16   ;;  %s1971_s16 = sphi %s2047_s16, %s2514_s16   ;;  %s1967_s15 = sphi %s2045_s15, %s2516_s15   ;;  %s1963_s14 = sphi %s2043_s14, %s2518_s14   ;;  %s1959_s13 = sphi %s2041_s13, %s2517_s13  }
   0xd   : > { %s2472_s18 = sadd.s32 4294967294, %s1971_s16   ;;  %s2064_s19 = sadd.s32 1, %s1971_s16  }
   0xe   : > { %2488 = sst [smem:[#allocation18_spill]] %s2064_s19  ;;  %s80_s20 = sadd.s32 1, %s1967_s15 }
   0xf   : > { %s77_s21 = ssub.s32 %s1971_s16, %s2064_s19  ;;  %p87_p0 = scmp.ne.s32.totalorder %s1967_s15, %s1963_s14 }
  0x10   : > { %p78_p1 = scmp.eq.s32.totalorder %s77_s21, 0  ;;  %p88_p2 = scmp.eq.s32.totalorder %s1971_s16, 0 }
  0x11   : > { %p93_p3 = scmp.ne.s32.totalorder %s1963_s14, %s1959_s13  ;;  %p94_p4 = scmp.eq.s32.totalorder %s2060_s17, 0 }
  0x12   : > { %s2075_s22 = scalar_select %p78_p1, %s1967_s15, %s80_s20  }
  0x13   : > { %p89_p5 = por %p88_p2, %p87_p0  ;;  %p2077_p6 = por %p94_p4, %p93_p3 }
  0x14   : > { %2489 = sst [smem:[#allocation19_spill]] %s2075_s22  ;;  %p2478_p7 = scmp.eq.s32.totalorder %s2060_s17, 1 }
  0x15   : > { %s2490_s23 = scalar_select %p2077_p6, 1, 0 }
  0x16   : > { %p264_p8 = scmp.eq.s32.totalorder %s2472_s18, 1  ;;  %p1584_p10 = scmp.lt.s32.totalorder %s1971_s16, 2 }
  0x17   : > { %p2088_p11 = por %p2478_p7, %p87_p0  ;;  %s2097_s26 = sand.u32 1, %s1967_s15  }
  0x18   : > { %p2092_p12 = por %p264_p8, %p93_p3  ;;  %s2477_s27 = sshll.u32 %s1971_s16, 7 }
  0x19   : > { %s2491_s24 = scalar_select %p2088_p11, 1, 0 }
  0x1a   : > { %s2492_s25 = scalar_select %p2092_p12, 1, 0 }
  0x1b   : > { %s2476_s28 = sshll.u32 %s2097_s26, 3  ;;  %p2101_p13 = pnand %p1584_p10, %p89_p5 }
  0x1c   : > { %2493 = sst [smem:[#allocation20_spill]] %s2492_s25  ;;  %s340_s30 = sand.u32 1, %s1971_s16  }
  0x1d   : > { %s2495_s3 = sld [smem:[#allocation21_spill]]  ;;  %s344_s20 = scalar_lea.vmem [#allocation6], %s2476_s28 }
  0x1e   : > { %s351_s21 = sshll.u32 %s344_s20, 4  ;;  %s1410_s18 = sshll.u32 %s2097_s26, 9  ;;  %s2115_s21 = int_to_ptr.vmem [resolvable:$true] %s351_s21 }
  0x1f   : > { %s2118_s22 = scalar_lea.sflag [#allocation7], %s340_s30  ;;  %p2124_p1 = pneg %p2101_p13 }
  0x23   : > { %s2111_s13 = scalar_lea.hbm %s2495_s3, %s2477_s27  ;;  %s1758_s20 = scalar_lea.hbm %s2495_s3, 256 }
  0x24   : > { %s1753_s15 = scalar_lea.hbm %s2111_s13, 128  ;;  %p1759_p4 = scmp.lt.u32.totalorder %s2111_s13, %s2495_s3 }
  0x25   : > { %p1754_p0 = scmp.ne.s32.totalorder %s2111_s13, %s1753_s15  ;;  %p1760_p5 = scmp.lt.u32.totalorder %s1758_s20, %s1753_s15 }
  0x26   : > { %p1762_p10 = scmp.lt.u32.totalorder %s1753_s15, %s2111_s13 }
  0x27   : > { %p1756_p2 = pnand %p2124_p1, %p1754_p0  ;;  %p1761_p8 = por %p1760_p5, %p1759_p4 }
  0x29   : > { %p1757_p3 = pneg %p1756_p2  ;;  %p1763_p9 = por %p1762_p10, %p1761_p8 }
  0x2b   : > { %p1764_p7 = pnand %p1763_p9, %p1757_p3 }
  0x2d   : > { %1767 = shalt.err (!%p1764_p7)
}
  0x2e   : > { %s1768_s30 = scalar_lea.vmem %s2115_s21, 128  ;;  %s1973_s11 = smov [#allocation6]  }
  0x2f   : > { %p1769_p0 = scmp.ne.s32.totalorder %s2115_s21, %s1768_s30  ;;  %s1773_s12 = sshll.u32 %s1973_s11, 4  ;;  %s1774_s12 = int_to_ptr.vmem [resolvable:$false] %s1773_s12 }
  0x30   : > { %s1775_s27 = scalar_lea.vmem %s1774_s12, 256  ;;  %p1776_p11 = scmp.lt.s32.totalorder %s2115_s21, %s1774_s12 }
  0x31   : > { %p1771_p2 = pnand %p1769_p0, %p2124_p1  ;;  %p1777_p6 = scmp.lt.s32.totalorder %s1775_s27, %s1768_s30 }
  0x33   : > { %p1772_p12 = pneg %p1771_p2  ;;  %p1778_p4 = por %p1777_p6, %p1776_p11 }
  0x35   : > { %p1779_p5 = pnand %p1778_p4, %p1772_p12 }
  0x37   : > { %1782 = shalt.err (!%p1779_p5)
}
  0x38   : > { %1573 = dma.hbm_to_vmem [thread:$0]  (!%p2101_p13), %s2111_s13, 128, %s2115_s21, %s2118_s22  }
  0x39   : > { %p1413_p7 = scmp.ge.s32.totalorder %s1971_s16, 1  ;;  %s362_s15 = scalar_lea.vmem [#allocation8], %s1410_s18 }
  0x3a   : > { %s369_s28 = sshll.u32 %s362_s15, 4  ;;  %p384_p6 = scmp.lt.s32.totalorder %s1971_s16, 3  ;;  %s2152_s28 = int_to_ptr.vmem [resolvable:$true] %s369_s28 }
  0x3b   : > { %s2498_s30 = sshll.u32 %s1971_s16, 7  ;;  %s2499_s3 = sshll.u32 %s2097_s26, 3 }
  0x3c   : > { %p2154_p9 = pnand %p1413_p7, %p384_p6  ;;  %s2163_s27 = scalar_lea.hbm %s2463_s2, %s2498_s30 }
  0x3d   : > { %s326_s18 = scalar_lea.vmem [#allocation3], %s2499_s3  ;;  %s1512_s21 = sshll.u32 %s1971_s16, 13 }
  0x3e   : > { %s2497_s20 = scalar_select %p2154_p9, 1, 0 }
  0x3f   : > { %s333_s13 = sshll.u32 %s326_s18, 4  ;;  %s323_s15 = scalar_lea.sflag [#allocation4], %s2097_s26  ;;  %s2167_s13 = int_to_ptr.vmem [resolvable:$true] %s333_s13 }
  0x40   : > { %s1783_s25 = scalar_lea.hbm %s2163_s27, 128  ;;  %s1788_s30 = scalar_lea.hbm %s2463_s2, 256 }
  0x41   : > { %p1784_p11 = scmp.ne.s32.totalorder %s2163_s27, %s1783_s25  ;;  %p1789_p8 = scmp.lt.u32.totalorder %s2163_s27, %s2463_s2 }
  0x42   : > { %p1790_p10 = scmp.lt.u32.totalorder %s1788_s30, %s1783_s25  ;;  %p1792_p2 = scmp.lt.u32.totalorder %s1783_s25, %s2163_s27 }
  0x43   : > { %p1786_p12 = pnand %p1784_p11, %p2124_p1 }
  0x44   : > { %p1791_p0 = por %p1790_p10, %p1789_p8 }
  0x45   : > { %p1787_p3 = pneg %p1786_p12 }
  0x46   : > { %p1793_p4 = por %p1792_p2, %p1791_p0 }
  0x48   : > { %p1794_p5 = pnand %p1793_p4, %p1787_p3 }
  0x4a   : > { %1797 = shalt.err (!%p1794_p5)
}
  0x4b   : > { %s1798_s3 = scalar_lea.vmem %s2167_s13, 128  ;;  %s1974_s8 = smov [#allocation3]  }
  0x4c   : > { %p1799_p7 = scmp.ne.s32.totalorder %s2167_s13, %s1798_s3  ;;  %s1803_s26 = sshll.u32 %s1974_s8, 4  ;;  %s1804_s26 = int_to_ptr.vmem [resolvable:$false] %s1803_s26 }
  0x4d   : > { %s1805_s10 = scalar_lea.vmem %s1804_s26, 256  ;;  %p1806_p12 = scmp.lt.s32.totalorder %s2167_s13, %s1804_s26 }
  0x4e   : > { %p1801_p6 = pnand %p1799_p7, %p2124_p1  ;;  %p1807_p9 = scmp.lt.s32.totalorder %s1805_s10, %s1798_s3 }
  0x50   : > { %p1802_p11 = pneg %p1801_p6  ;;  %p1808_p8 = por %p1807_p9, %p1806_p12 }
  0x52   : > { %p1809_p10 = pnand %p1808_p8, %p1802_p11 }
  0x54   : > { %1812 = shalt.err (!%p1809_p10)
}
  0x55   : > { %1570 = dma.hbm_to_vmem [thread:$0]  (!%p2101_p13), %s2163_s27, 128, %s2167_s13, %s323_s15  }
  0x56   : > { %s2197_s11 = scalar_lea.hbm %s2465_s4, %s1512_s21  ;;  %s1818_s8 = scalar_lea.hbm %s2465_s4, 16384 }
  0x57   : > { %s1813_s30 = scalar_lea.hbm %s2197_s11, 8192  ;;  %p1819_p2 = scmp.lt.u32.totalorder %s2197_s11, %s2465_s4 }
  0x58   : > { %p1814_p9 = scmp.ne.s32.totalorder %s2197_s11, %s1813_s30  ;;  %p1820_p4 = scmp.lt.u32.totalorder %s1818_s8, %s1813_s30 }
  0x59   : > { %p1822_p7 = scmp.lt.u32.totalorder %s1813_s30, %s2197_s11 }
  0x5a   : > { %p1816_p3 = pnand %p1814_p9, %p2124_p1  ;;  %p1821_p5 = por %p1820_p4, %p1819_p2 }
  0x5c   : > { %p1817_p0 = pneg %p1816_p3  ;;  %p1823_p6 = por %p1822_p7, %p1821_p5 }
  0x5e   : > { %p1824_p11 = pnand %p1823_p6, %p1817_p0 }
  0x60   : > { %1827 = shalt.err (!%p1824_p11)
}
  0x61   : > { %s1828_s21 = scalar_lea.vmem %s2152_s28, 8192  ;;  %s1975_s15 = smov [#allocation8]  }
  0x62   : > { %p1829_p12 = scmp.ne.s32.totalorder %s2152_s28, %s1828_s21  ;;  %s1833_s26 = sshll.u32 %s1975_s15, 4  ;;  %s1834_s26 = int_to_ptr.vmem [resolvable:$false] %s1833_s26 }
  0x63   : > { %s1835_s10 = scalar_lea.vmem %s1834_s26, 16384  ;;  %p1836_p9 = scmp.lt.s32.totalorder %s2152_s28, %s1834_s26 }
  0x64   : > { %p1831_p8 = pnand %p1829_p12, %p2124_p1  ;;  %p1837_p3 = scmp.lt.s32.totalorder %s1835_s10, %s1828_s21 }
  0x66   : > { %p1832_p10 = pneg %p1831_p8  ;;  %p1838_p2 = por %p1837_p3, %p1836_p9 }
  0x68   : > { %p1839_p4 = pnand %p1838_p2, %p1832_p10 }
  0x6a   : > { %1842 = shalt.err (!%p1839_p4)
}
  0x6b   : > { %s1976_s25 = smov 256   ;;  %s1977_s18 = smov 16  }
  0x6c   : > { %1576 = dma.hbm_to_vmem [thread:$0]  (!%p2101_p13), %s2197_s11, 8192, %s2152_s28, %s2118_s22, %s1976_s25, %s1976_s25, %s1977_s18  }
  0x6d   : > { %p2500_p1 = scmp.ne.s32.totalorder %s2497_s20, 0 }
  0x6e   : > { %s390_s19 = sand.u32 (!%p2500_p1), 1, %s1963_s14   ;;  %p2501_p0 = scmp.ne.s32.totalorder (!%p2500_p1), %s2490_s23, 0 }
  0x6f   : > { %388 = sbr.rel (%p2500_p1) target bundleno = 1097 (0x449), region = 52  ;;  %s2224_s30 = sshll.u32 (!%p2500_p1), %s390_s19, 3 }
  0x70   : > { %s391_s12 = scalar_lea.sflag (!%p2500_p1), [#allocation4], %s390_s19  ;;  %s394_s3 = scalar_lea.vmem (!%p2500_p1), [#allocation3], %s2224_s30 }
  0x76   : > { %1942 = dma.done.wait (%p2501_p0), %s391_s12, 128  }
  0x77   : > { %1944 = vsyncadd (%p2501_p0), %s391_s12, 4294967168  ;;  %s399_s22 = sand.u32 1, %s2060_s17   ;;  %s403_s28 = scalar_lea.vmem [#allocation6], %s2224_s30 }
  0x78   : > { %s400_s29 = scalar_lea.sflag [#allocation7], %s399_s22 }
  0x79   : > { %1946 = dma.done.wait (%p2501_p0), %s400_s29, 8320  }
  0x7a   : > { %1948 = vsyncadd (%p2501_p0), %s400_s29, 4294958976  ;;  %s1416_s20 = sshll.u32 %s390_s19, 9  ;;  %p468_p13 = scmp.lt.s32.totalorder %s2060_s17, 1 }
  0x7b   : > { %s2246_s15 = scalar_lea.vmem [#allocation8], %s1416_s20  ;;  %s460_s26 = scalar_lea.vmem [#allocation10], %s2224_s30 }
  0x7c   : > { %s469_s11 = scalar_select %p468_p13, %s2060_s17, 1 }
  0x7d   : > { %s467_s10 = scalar_lea.vmem [#allocation12], %s2224_s30  ;;  %p1420_p5 = scmp.ne.s32.totalorder %s2060_s17, 0 }
  0x7e   : > { %s1419_s8 = sshll.u32 %s469_s11, 2  ;;  %v479_v0 = vld [vmem:[%s2461_s0] sm:$0xff] (!%p1420_p5)  ;;  %v1978_v2 = vmov (!%p1420_p5), 0   ;;  %v1979_v3 = vmov (!%p1420_p5), 0.0   ;;  %v1630_v4 = vld [vmem:[%s2462_s1 + $0x8] sm:$0xff] (!%p1420_p5)   ;;  %vm1980_vm0 = vmmov (!%p1420_p5), 0   ;;  %v477_v5 = vlaneseq (!%p1420_p5) }
  0x7f   : > { %s2244_s21 = scalar_lea.vmem %s2466_s5, %s1419_s8  ;;  %476 = sbr.rel (%p1420_p5) target bundleno = 475 (0x1db), region = 68  ;;  %v1629_v1 = vld [vmem:[%s2462_s1] sm:$0xff] (!%p1420_p5)   ;;  %1628 = vset.pattern.permute.xlu0 (!%p1420_p5), %v1978_v2  ;;  %1525 = vmatprep.subr.bf16.mxu0 (!%p1420_p5), %v1979_v3  ;;  %vm503_vm2 = vcmask (!%p1420_p5), 261120  }
  0x80   : > { %481 = vperm.xlu0 (!%p1420_p5), %1628, %v479_v0   ;;  %1526 = vmatpush3.bf16.msra.mxu0 (!%p1420_p5), %v1629_v1  ;;  %v478_v6 = vand.u32 (!%p1420_p5), 127, %v477_v5 }
  0x81   : > { %1527 = vmatprep.subr.bf16.mxu0 (!%p1420_p5), %v1979_v3  ;;  %1529 = vmatprep.mubr.msk.bf16.mxu0 (!%p1420_p5), %vm1980_vm0, %v1979_v3 }
  0x84   : > { %1528 = vmatpush3.bf16.msra.mxu0 (!%p1420_p5), %v1630_v4 }
  0xff   : > { %v482_v7 = vpop.permute.xlu0 %481 }
 0x100   : > { %vm483_vm1 = vcmp.eq.s32.totalorder %v478_v6, %v482_v7 }
 0x101   : > { %v1421_v8 = vsel %vm483_vm1, 1.0, %v1979_v3 }
 0x102   : > { %v486_v9 = vpack.c.bf16 %v1421_v8, %v1421_v8 }
 0x104   : > { %1530 = vmatmul.mubr.msk.bf16.vlgmr.msra.gmra.mrb[0].mxu0 %vm503_vm2, %v486_v9 }
 0x1d7   : > { %v541_v10 = vpop.f32.mrb[0].mxu0 }
 0x1d8   : > { %v547_v11 = vpack.c.bf16 %v541_v10, %v541_v10  ;;  %v1531_v12 = vpop.f32.mrb[1].mxu0 }
 0x1d9   : > { %v544_v13 = vpop.f32.mrb[2].mxu0 }
 0x1da   : > { %548 = vst [vmem:[#allocation2] sm:$0xf] %v547_v11  ;;  %v1532_v14 = vpop.f32.mrb[3].mxu0 }
 0x1db PF: > { %v1631_v15 = vld [vmem:[%s2246_s15 + $0x4] ss:$16 sps:$4 sm:$0xff]   ;;  %v1633_v16 = vld [vmem:[%s2246_s15] ss:$16 sps:$4 sm:$0xff]   ;;  %v1642_v20 = vld [vmem:[%s2246_s15 + $0xc] ss:$16 sps:$4 sm:$0xff]  }
 0x1dc   : > { %966 = vmatprep.subr.bf16.mxu0 %v1631_v15  ;;  %v1634_v17 = vld [vmem:[%s2246_s15 + $0x24] ss:$16 sps:$4 sm:$0xff]   ;;  %v1636_v18 = vld [vmem:[%s2246_s15 + $0x20] ss:$16 sps:$4 sm:$0xff]   ;;  %v1645_v21 = vld [vmem:[%s2246_s15 + $0x8] ss:$16 sps:$4 sm:$0xff]   ;;  %1007 = vmatprep.subr.bf16.mxu1 %v1642_v20  ;;  %v619_v20 = vlaneseq }
 0x1dd   : > { %967 = vmatpush1.bf16.msra.mxu0 %v1633_v16  ;;  %v1637_v19 = vld [vmem:[%s2246_s15 + $0x44] ss:$16 sps:$4 sm:$0xff]   ;;  %v1639_v22 = vld [vmem:[%s2246_s15 + $0x40] ss:$16 sps:$4 sm:$0xff]   ;;  %1008 = vmatpush1.bf16.msra.mxu1 %v1645_v21  ;;  %v1648_v24 = vld [vmem:[%s2246_s15 + $0x2c] ss:$16 sps:$4 sm:$0xff]  }
 0x1de   : > { %968 = vmatprep.subr.bf16.mxu0 %v1634_v17  ;;  %v1640_v23 = vld [vmem:[%s2246_s15 + $0x64] ss:$16 sps:$4 sm:$0xff]   ;;  %v1651_v25 = vld [vmem:[%s2246_s15 + $0x28] ss:$16 sps:$4 sm:$0xff]   ;;  %1009 = vmatprep.subr.bf16.mxu1 %v1648_v24  ;;  %v1644_v26 = vld [vmem:[%s2246_s15 + $0x60] ss:$16 sps:$4 sm:$0xff]  }
 0x1df   : > { %v1646_v27 = vld [vmem:[%s2246_s15 + $0x84] ss:$16 sps:$4 sm:$0xff]   ;;  %v1654_v28 = vld [vmem:[%s2246_s15 + $0x4c] ss:$16 sps:$4 sm:$0xff]   ;;  %v1657_v29 = vld [vmem:[%s2246_s15 + $0x48] ss:$16 sps:$4 sm:$0xff]  }
 0x1e0   : > { %v1660_v30 = vld [vmem:[%s2246_s15 + $0x6c] ss:$16 sps:$4 sm:$0xff]   ;;  %v1650_v31 = vld [vmem:[%s2246_s15 + $0x80] ss:$16 sps:$4 sm:$0xff]   ;;  %v1652_v32 = vld [vmem:[%s2246_s15 + $0xa4] ss:$16 sps:$4 sm:$0xff]  }
 0x1e1   : > { %969 = vmatpush1.bf16.msra.mxu0 %v1636_v18  ;;  %1010 = vmatpush1.bf16.msra.mxu1 %v1651_v25  ;;  %v1663_v33 = vld [vmem:[%s2246_s15 + $0x68] ss:$16 sps:$4 sm:$0xff]   ;;  %v1666_v34 = vld [vmem:[%s2246_s15 + $0x8c] ss:$16 sps:$4 sm:$0xff]   ;;  %v1656_v35 = vld [vmem:[%s2246_s15 + $0xa0] ss:$16 sps:$4 sm:$0xff]  }
 0x1e2   : > { %970 = vmatprep.subr.bf16.mxu0 %v1637_v19  ;;  %1011 = vmatprep.subr.bf16.mxu1 %v1654_v28  ;;  %v1658_v36 = vld [vmem:[%s2246_s15 + $0xc4] ss:$16 sps:$4 sm:$0xff]   ;;  %v1669_v37 = vld [vmem:[%s2246_s15 + $0x88] ss:$16 sps:$4 sm:$0xff]   ;;  %v1672_v38 = vld [vmem:[%s2246_s15 + $0xac] ss:$16 sps:$4 sm:$0xff]  }
 0x1e3   : > { %v1662_v39 = vld [vmem:[%s2246_s15 + $0xc0] ss:$16 sps:$4 sm:$0xff]   ;;  %v1664_v40 = vld [vmem:[%s2246_s15 + $0xe4] ss:$16 sps:$4 sm:$0xff]   ;;  %v1675_v41 = vld [vmem:[%s2246_s15 + $0xa8] ss:$16 sps:$4 sm:$0xff]  }
 0x1e4   : > { %v1678_v42 = vld [vmem:[%s2246_s15 + $0xcc] ss:$16 sps:$4 sm:$0xff]   ;;  %v1668_v43 = vld [vmem:[%s2246_s15 + $0xe0] ss:$16 sps:$4 sm:$0xff]   ;;  %v1670_v44 = vld [vmem:[%s2246_s15 + $0x104] ss:$16 sps:$4 sm:$0xff]  }
 0x1e5   : > { %971 = vmatpush1.bf16.msra.mxu0 %v1639_v22  ;;  %1012 = vmatpush1.bf16.msra.mxu1 %v1657_v29  ;;  %v1681_v45 = vld [vmem:[%s2246_s15 + $0xc8] ss:$16 sps:$4 sm:$0xff]   ;;  %v1684_v46 = vld [vmem:[%s2246_s15 + $0xec] ss:$16 sps:$4 sm:$0xff]   ;;  %v1674_v47 = vld [vmem:[%s2246_s15 + $0x100] ss:$16 sps:$4 sm:$0xff]  }
 0x1e6   : > { %972 = vmatprep.subr.bf16.mxu0 %v1640_v23  ;;  %1013 = vmatprep.subr.bf16.mxu1 %v1660_v30  ;;  %v1676_v48 = vld [vmem:[%s2246_s15 + $0x124] ss:$16 sps:$4 sm:$0xff]   ;;  %v1687_v49 = vld [vmem:[%s2246_s15 + $0xe8] ss:$16 sps:$4 sm:$0xff]   ;;  %v1690_v50 = vld [vmem:[%s2246_s15 + $0x10c] ss:$16 sps:$4 sm:$0xff]  }
 0x1e7   : > { %v1680_v51 = vld [vmem:[%s2246_s15 + $0x120] ss:$16 sps:$4 sm:$0xff]   ;;  %v1682_v52 = vld [vmem:[%s2246_s15 + $0x144] ss:$16 sps:$4 sm:$0xff]   ;;  %v1693_v53 = vld [vmem:[%s2246_s15 + $0x108] ss:$16 sps:$4 sm:$0xff]  }
 0x1e8   : > { %v1696_v54 = vld [vmem:[%s2246_s15 + $0x12c] ss:$16 sps:$4 sm:$0xff]   ;;  %v1686_v55 = vld [vmem:[%s2246_s15 + $0x140] ss:$16 sps:$4 sm:$0xff]   ;;  %v1688_v57 = vld [vmem:[%s2246_s15 + $0x164] ss:$16 sps:$4 sm:$0xff]  }
 0x1e9   : > { %973 = vmatpush1.bf16.msra.mxu0 %v1644_v26  ;;  %1014 = vmatpush1.bf16.msra.mxu1 %v1663_v33  ;;  %v549_v56 = vld [vmem:[%s394_s3] sm:$0xff]  ;;  %v620_v21 = vshrl.u32 %v619_v20, 7  ;;  %v617_v23 = vld [vmem:[%s2244_s21] sm:$0xf]  ;;  %p1494_p7 = scmp.ne.s32.totalorder %s2060_s17, 1 }
 0x1ea   : > { %974 = vmatprep.subr.bf16.mxu0 %v1646_v27  ;;  %1015 = vmatprep.subr.bf16.mxu1 %v1666_v34  ;;  %v550_v58 = vpack.c.bf16 %v549_v56, %v549_v56  ;;  %v1699_v59 = vld [vmem:[%s2246_s15 + $0x128] ss:$16 sps:$4 sm:$0xff]   ;;  %v1702_v60 = vld [vmem:[%s2246_s15 + $0x14c] ss:$16 sps:$4 sm:$0xff]   ;;  %v1692_v61 = vld [vmem:[%s2246_s15 + $0x160] ss:$16 sps:$4 sm:$0xff]  }
 0x1eb   : > { %v1694_v62 = vld [vmem:[%s2246_s15 + $0x184] ss:$16 sps:$4 sm:$0xff]   ;;  %v1705_v63 = vld [vmem:[%s2246_s15 + $0x148] ss:$16 sps:$4 sm:$0xff]   ;;  %v1708_v0 = vld [vmem:[%s2246_s15 + $0x16c] ss:$16 sps:$4 sm:$0xff]  }
 0x1ec   : > { %551 = vst [vmem:[#allocation2 + $0x4] sm:$0xf] %v550_v58  ;;  %v1698_v1 = vld [vmem:[%s2246_s15 + $0x180] ss:$16 sps:$4 sm:$0xff]   ;;  %v1700_v2 = vld [vmem:[%s2246_s15 + $0x1a4] ss:$16 sps:$4 sm:$0xff]  }
 0x1ed   : > { %975 = vmatpush1.bf16.msra.mxu0 %v1650_v31  ;;  %1016 = vmatpush1.bf16.msra.mxu1 %v1669_v37  ;;  %v1711_v3 = vld [vmem:[%s2246_s15 + $0x168] ss:$16 sps:$4 sm:$0xff]   ;;  %v1714_v5 = vld [vmem:[%s2246_s15 + $0x18c] ss:$16 sps:$4 sm:$0xff]   ;;  %v1704_v7 = vld [vmem:[%s2246_s15 + $0x1a0] ss:$16 sps:$4 sm:$0xff]  }
 0x1ee   : > { %976 = vmatprep.subr.bf16.mxu0 %v1652_v32  ;;  %1017 = vmatprep.subr.bf16.mxu1 %v1672_v38  ;;  %v1706_v8 = vld [vmem:[%s2246_s15 + $0x1c4] ss:$16 sps:$4 sm:$0xff]   ;;  %v1717_v9 = vld [vmem:[%s2246_s15 + $0x188] ss:$16 sps:$4 sm:$0xff]   ;;  %v1720_v10 = vld [vmem:[%s2246_s15 + $0x1ac] ss:$16 sps:$4 sm:$0xff]  }
 0x1ef   : > { %v1710_v11 = vld [vmem:[%s2246_s15 + $0x1c0] ss:$16 sps:$4 sm:$0xff]   ;;  %v1712_v12 = vld [vmem:[%s2246_s15 + $0x1e4] ss:$16 sps:$4 sm:$0xff]   ;;  %v1722_v13 = vld [vmem:[%s2246_s15 + $0x1a8] ss:$16 sps:$4 sm:$0xff]  }
 0x1f0   : > { %v1723_v14 = vld [vmem:[%s2246_s15 + $0x1cc] ss:$16 sps:$4 sm:$0xff]   ;;  %v1716_v15 = vld [vmem:[%s2246_s15 + $0x1e0] ss:$16 sps:$4 sm:$0xff]   ;;  %v1725_v16 = vld [vmem:[%s2246_s15 + $0x1c8] ss:$16 sps:$4 sm:$0xff]  }
 0x1f1   : > { %977 = vmatpush1.bf16.msra.mxu0 %v1656_v35  ;;  %1018 = vmatpush1.bf16.msra.mxu1 %v1675_v41  ;;  %v1726_v17 = vld [vmem:[%s2246_s15 + $0x1ec] ss:$16 sps:$4 sm:$0xff]   ;;  %v1728_v19 = vld [vmem:[%s2246_s15 + $0x1e8] ss:$16 sps:$4 sm:$0xff]   ;;  %v621_v22 = vsub.s32 0, %v620_v21  ;;  %v625_v24 = vsub.s32 1, %v620_v21 }
 0x1f2   : > { %978 = vmatprep.subr.bf16.mxu0 %v1658_v36  ;;  %1019 = vmatprep.subr.bf16.mxu1 %v1678_v42  ;;  %v633_v27 = vsub.s32 3, %v620_v21  ;;  %v629_v37 = vsub.s32 2, %v620_v21  ;;  %vm1982_vm3 = vmmov (!%p1494_p7), 0  }
 0x1f3   : > { %v552_v4 = vld [vmem:[#allocation2] sm:$0xff]  ;;  %v622_v25 = vrot.slane %v617_v23, %v621_v22  ;;  %v626_v26 = vrot.slane %v617_v23, %v625_v24 }
 0x1f4   : > { %v1426_v6 = vcombine.high %v552_v4, %v552_v4  ;;  %v1425_v18 = vcombine.low %v552_v4, %v552_v4  ;;  %v634_v35 = vrot.slane %v617_v23, %v633_v27  ;;  %v630_v42 = vrot.slane %v617_v23, %v629_v37  ;;  %v1749_v4 = vld [vmem:[%s2467_s6 + $0x20] sm:$0xff] (!%p1494_p7)  }
 0x1f5   : > { %979 = vmatpush1.bf16.msra.mxu0 %v1662_v39  ;;  %1020 = vmatpush1.bf16.msra.mxu1 %v1681_v45 }
 0x1f6   : > { %980 = vmatprep.subr.bf16.mxu0 %v1664_v40  ;;  %1021 = vmatprep.subr.bf16.mxu1 %v1684_v46 }
 0x1f7   : > { %998 = vmatprep.mubr.bf16.mxu0 %v1426_v6  ;;  %1039 = vmatprep.mubr.bf16.mxu1 %v1426_v6  ;;  %v1751_v6 = vld [vmem:[%s2467_s6 + $0x30] sm:$0xff] (!%p1494_p7)  }
 0x1f9   : > { %981 = vmatpush1.bf16.msra.mxu0 %v1668_v43  ;;  %1022 = vmatpush1.bf16.msra.mxu1 %v1687_v49 }
 0x1fa   : > { %982 = vmatprep.subr.bf16.mxu0 %v1670_v44  ;;  %1023 = vmatprep.subr.bf16.mxu1 %v1690_v50 }
 0x1fd   : > { %983 = vmatpush1.bf16.msra.mxu0 %v1674_v47  ;;  %1024 = vmatpush1.bf16.msra.mxu1 %v1693_v53 }
 0x1fe   : > { %984 = vmatprep.subr.bf16.mxu0 %v1676_v48  ;;  %1025 = vmatprep.subr.bf16.mxu1 %v1696_v54 }
 0x201   : > { %985 = vmatpush1.bf16.msra.mxu0 %v1680_v51  ;;  %1026 = vmatpush1.bf16.msra.mxu1 %v1699_v59 }
 0x202   : > { %986 = vmatprep.subr.bf16.mxu0 %v1682_v52  ;;  %1027 = vmatprep.subr.bf16.mxu1 %v1702_v60  ;;  %v1067_v52 = vld [vmem:[%s403_s28] sm:$0xff] }
 0x205   : > { %987 = vmatpush1.bf16.msra.mxu0 %v1686_v55  ;;  %1028 = vmatpush1.bf16.msra.mxu1 %v1705_v63  ;;  %v1745_v63 = vld [vmem:[%s2467_s6] sm:$0xff] (!%p1494_p7)  }
 0x206   : > { %988 = vmatprep.subr.bf16.mxu0 %v1688_v57  ;;  %1029 = vmatprep.subr.bf16.mxu1 %v1708_v0  ;;  %v1981_v0 = vmov (!%p1494_p7), 0.0  }
 0x209   : > { %989 = vmatpush1.bf16.msra.mxu0 %v1692_v61  ;;  %1030 = vmatpush1.bf16.msra.mxu1 %v1711_v3  ;;  %v1748_v3 = vld [vmem:[%s2467_s6 + $0x18] sm:$0xff] (!%p1494_p7)  }
 0x20a   : > { %990 = vmatprep.subr.bf16.mxu0 %v1694_v62  ;;  %1031 = vmatprep.subr.bf16.mxu1 %v1714_v5  ;;  %v1750_v5 = vld [vmem:[%s2467_s6 + $0x28] sm:$0xff] (!%p1494_p7)  }
 0x20d   : > { %991 = vmatpush1.bf16.msra.mxu0 %v1698_v1  ;;  %1032 = vmatpush1.bf16.msra.mxu1 %v1717_v9  ;;  %v1746_v1 = vld [vmem:[%s2467_s6 + $0x8] sm:$0xff] (!%p1494_p7)  }
 0x20e   : > { %992 = vmatprep.subr.bf16.mxu0 %v1700_v2  ;;  %1033 = vmatprep.subr.bf16.mxu1 %v1720_v10  ;;  %v1747_v2 = vld [vmem:[%s2467_s6 + $0x10] sm:$0xff] (!%p1494_p7)  }
 0x211   : > { %993 = vmatpush1.bf16.msra.mxu0 %v1704_v7  ;;  %1034 = vmatpush1.bf16.msra.mxu1 %v1722_v13  ;;  %v1752_v7 = vld [vmem:[%s2467_s6 + $0x38] sm:$0xff] (!%p1494_p7)  }
 0x212   : > { %994 = vmatprep.subr.bf16.mxu0 %v1706_v8  ;;  %1035 = vmatprep.subr.bf16.mxu1 %v1723_v14  ;;  %v1495_v8 = vld [vmem:[%s2468_s7] ss:$0 sm:$0xff] (!%p1494_p7) }
 0x215   : > { %995 = vmatpush1.bf16.msra.mxu0 %v1710_v11  ;;  %1036 = vmatpush1.bf16.msra.mxu1 %v1725_v16 }
 0x216   : > { %996 = vmatprep.subr.bf16.mxu0 %v1712_v12  ;;  %1037 = vmatprep.subr.bf16.mxu1 %v1726_v17 }
 0x219   : > { %997 = vmatpush1.bf16.msra.mxu0 %v1716_v15  ;;  %1038 = vmatpush1.bf16.msra.mxu1 %v1728_v19 }
 0x21a   : > { %1533 = vmatprep.subr.bf16.mxu0 (!%p1494_p7), %v1981_v0 }
 0x21c   : > { %999 = vmatmul.mubr.bf16.vlgmr.msra.gmra.mrb[0].mxu0 %v1425_v18  ;;  %1040 = vmatmul.mubr.bf16.vlgmr.msra.gmra.mrb[0].mxu1 %v1425_v18 }
 0x21d   : > { %1534 = vmatpush3.bf16.msra.mxu0 (!%p1494_p7), %v1745_v63  ;;  %1549 = vmatprep.mubr.msk.bf16.mxu0 (!%p1494_p7), %vm1982_vm3, %v1981_v0 }
 0x21e   : > { %1535 = vmatprep.subr.bf16.mxu0 (!%p1494_p7), %v1981_v0 }
 0x221   : > { %1536 = vmatpush3.bf16.msra.mxu0 (!%p1494_p7), %v1746_v1 }
 0x222   : > { %1537 = vmatprep.subr.bf16.mxu0 (!%p1494_p7), %v1981_v0 }
 0x225   : > { %1538 = vmatpush3.bf16.msra.mxu0 (!%p1494_p7), %v1747_v2 }
 0x226   : > { %1539 = vmatprep.subr.bf16.mxu0 (!%p1494_p7), %v1981_v0 }
 0x229   : > { %1540 = vmatpush3.bf16.msra.mxu0 (!%p1494_p7), %v1748_v3 }
 0x22a   : > { %1541 = vmatprep.subr.bf16.mxu0 (!%p1494_p7), %v1981_v0 }
 0x22d   : > { %1542 = vmatpush3.bf16.msra.mxu0 (!%p1494_p7), %v1749_v4 }
 0x22e   : > { %1543 = vmatprep.subr.bf16.mxu0 (!%p1494_p7), %v1981_v0 }
 0x231   : > { %1544 = vmatpush3.bf16.msra.mxu0 (!%p1494_p7), %v1750_v5 }
 0x232   : > { %1545 = vmatprep.subr.bf16.mxu0 (!%p1494_p7), %v1981_v0 }
 0x235   : > { %1546 = vmatpush3.bf16.msra.mxu0 (!%p1494_p7), %v1751_v6 }
 0x236   : > { %1547 = vmatprep.subr.bf16.mxu0 (!%p1494_p7), %v1981_v0 }
 0x239   : > { %1548 = vmatpush3.bf16.msra.mxu0 (!%p1494_p7), %v1752_v7 }
 0x2ef   : > { %v1000_v28 = vpop.f32.mrb[0].mxu0  ;;  %v1041_v38 = vpop.f32.mrb[0].mxu1 }
 0x2f0   : > { %v1001_v29 = vadd.f32 %v1000_v28, %v622_v25  ;;  %v1002_v30 = vpop.f32.mrb[1].mxu0  ;;  %v1043_v39 = vpop.f32.mrb[1].mxu1  ;;  %v1042_v45 = vadd.f32 %v1041_v38, %v630_v42 }
 0x2f1   : > { %v1003_v31 = vadd.f32 %v1002_v30, %v626_v26  ;;  %v1004_v32 = vpop.f32.mrb[2].mxu0  ;;  %v1044_v40 = vadd.f32 %v1043_v39, %v634_v35  ;;  %v1045_v41 = vpop.f32.mrb[2].mxu1 }
 0x2f2   : > { %v1491_v33 = vmul.f32 -1.442695, %v1001_v29  ;;  %v1005_v34 = vpop.f32.mrb[3].mxu0  ;;  %v1046_v43 = vpop.f32.mrb[3].mxu1 }
 0x2f3   : > { %v1492_v36 = vmul.f32 -1.442695, %v1003_v31  ;;  %v1493_v44 = vmul.f32 -1.442695, %v1044_v40 }
 0x2f4   : > { %1729 = vpow2.f32 %v1491_v33 }
 0x2f5   : > { %1731 = vpow2.f32 %v1492_v36 }
 0x2f6   : > { %1733 = vpow2.f32 %v1493_v44 }
 0x2f7   : > { %1735 = vtanh.f32 %v1042_v45 }
 0x2fe   : > { %v1730_v46 = vpop.eup %1729 }
 0x2ff   : > { %v1732_v47 = vpop.eup %1731  ;;  %v1051_v48 = vadd.f32 1.0, %v1730_v46 }
 0x300   : > { %v1057_v49 = vadd.f32 1.0, %v1732_v47  ;;  %v1734_v50 = vpop.eup %1733 }
 0x301   : > { %1737 = vrcp.f32 %v1051_v48  ;;  %v1736_v51 = vpop.eup %1735  ;;  %v1064_v54 = vadd.f32 1.0, %v1734_v50 }
 0x302   : > { %1739 = vrcp.f32 %v1057_v49 }
 0x303   : > { %1741 = vrcp.f32 %v1064_v54 }
 0x30b   : > { %v1738_v53 = vpop.eup %1737 }
 0x30c   : > { %v1740_v55 = vpop.eup %1739  ;;  %v1069_v56 = vmul.f32 %v1738_v53, %v1736_v51 }
 0x30d   : > { %v1068_v57 = vmul.f32 %v1740_v55, %v1067_v52  ;;  %v1742_v59 = vpop.eup %1741 }
 0x30f   : > { %v1070_v58 = vadd.f32 %v1069_v56, %v1068_v57 }
 0x311   : > { %1743 = vtanh.f32 %v1070_v58  ;;  %1074 = vst [vmem:[%s467_s10] sm:$0xff] %v1070_v58 }
 0x31a   : > { %1080 = sbr.rel (%p1494_p7) target bundleno = 1015 (0x3f7), region = 72 }
 0x31b   : > { %v1744_v60 = vpop.eup %1743 }
 0x31c   : > { %v1072_v61 = vmul.f32 %v1744_v60, %v1742_v59 }
 0x31e   : > { %1073 = vst [vmem:[%s460_s26] sm:$0xff] %v1072_v61  ;;  %v1075_v62 = vpack.c.bf16 %v1072_v61, %v1072_v61 }
 0x320   : > { %1076 = vst [vmem:[#allocation2] sm:$0xf] %v1075_v62  ;;  %1550 = vmatmul.mubr.bf16.vlgmr.msra.gmra.mrb[0].mxu0 (!%p1494_p7), %v1075_v62 }
 0x3f3   : > { %v1186_v9 = vpop.f32.mrb[0].mxu0 }
 0x3f4   : > { %v1187_v10 = vadd.f32 %v1495_v8, %v1186_v9  ;;  %v1551_v11 = vpop.f32.mrb[1].mxu0 }
 0x3f5   : > { %v1189_v12 = vpop.f32.mrb[2].mxu0 }
 0x3f6   : > { %1192 = vst [vmem:[#allocation9] sm:$0xff] %v1187_v10  ;;  %v1552_v13 = vpop.f32.mrb[3].mxu0 }
 0x3f7 PF: > { %s1507_s11 = sshll.u32 %s2060_s17, 7  ;;  %s1223_s21 = sshll.u32 %s460_s26, 4  ;;  %s1224_s21 = int_to_ptr.vmem [resolvable:$true] %s1223_s21 }
 0x3f8   : > { %s2367_s13 = scalar_lea.hbm %s2470_s9, %s1507_s11  ;;  %s2373_s15 = scalar_lea.sflag [#allocation11], %s399_s22 }
 0x3f9   : > { %s1843_s23 = scalar_lea.vmem %s1224_s21, 128  ;;  %p2502_p11 = scmp.ne.s32.totalorder %s2491_s24, 0 }
 0x3fa   : > { %p1844_p6 = scmp.ne.s32.totalorder %s1224_s21, %s1843_s23  ;;  %s1983_s25 = smov [#allocation10]  }
 0x3fb   : > { %s1847_s18 = sshll.u32 %s1983_s25, 4  ;;  %s1848_s18 = int_to_ptr.vmem [resolvable:$false] %s1847_s18 }
 0x3fc   : > { %p1845_p12 = pnand %p1844_p6, %p2502_p11  ;;  %s1849_s19 = scalar_lea.vmem %s1848_s18, 256 }
 0x3fd   : > { %p1850_p10 = scmp.lt.s32.totalorder %s1224_s21, %s1848_s18  ;;  %p1851_p9 = scmp.lt.s32.totalorder %s1849_s19, %s1843_s23 }
 0x3fe   : > { %p1846_p8 = pneg %p1845_p12 }
 0x3ff   : > { %p1852_p3 = por %p1851_p9, %p1850_p10 }
 0x401   : > { %p1853_p2 = pnand %p1852_p3, %p1846_p8 }
 0x403   : > { %1856 = shalt.err (!%p1853_p2)
}
 0x404   : > { %s1857_s22 = scalar_lea.hbm %s2367_s13, 128  ;;  %s1861_s29 = scalar_lea.hbm %s2470_s9, 256 }
 0x405   : > { %p1858_p4 = scmp.ne.s32.totalorder %s2367_s13, %s1857_s22  ;;  %p1862_p13 = scmp.lt.u32.totalorder %s2367_s13, %s2470_s9 }
 0x406   : > { %p1863_p5 = scmp.lt.u32.totalorder %s1861_s29, %s1857_s22  ;;  %p1865_p6 = scmp.lt.u32.totalorder %s1857_s22, %s2367_s13 }
 0x407   : > { %p1859_p1 = pnand %p1858_p4, %p2502_p11 }
 0x408   : > { %p1864_p7 = por %p1863_p5, %p1862_p13 }
 0x409   : > { %p1860_p0 = pneg %p1859_p1 }
 0x40a   : > { %p1866_p12 = por %p1865_p6, %p1864_p7 }
 0x40c   : > { %p1867_p8 = pnand %p1866_p12, %p1860_p0 }
 0x40e   : > { %1870 = shalt.err (!%p1867_p8)
}
 0x40f   : > { %1561 = dma.vmem_to_hbm [thread:$0]  (%p2502_p11), %s1224_s21, 128, %s2367_s13, %s2373_s15  }
 0x410   : > { %s1984_s20 = smov [#allocation9]   ;;  %s2503_s25 = sld [smem:[#allocation23_spill]] }
 0x411   : > { %s1210_s8 = sshll.u32 %s1984_s20, 4  ;;  %s1236_s19 = sshll.u32 %s467_s10, 4  ;;  %s1211_s8 = int_to_ptr.vmem [resolvable:$true] %s1210_s8  ;;  %s1237_s19 = int_to_ptr.vmem [resolvable:$true] %s1236_s19 }
 0x412   : > { %s1871_s22 = scalar_lea.vmem %s1211_s8, 128  ;;  %p2504_p9 = scmp.eq.s32.totalorder %s2060_s17, 1 }
 0x413   : > { %p1872_p10 = scmp.ne.s32.totalorder %s1211_s8, %s1871_s22  ;;  %p1878_p4 = scmp.lt.s32.totalorder %s1211_s8, %s1211_s8 }
 0x414   : > { %p1879_p1 = scmp.lt.s32.totalorder %s1871_s22, %s1871_s22 }
 0x415   : > { %p1873_p3 = pnand %p1872_p10, %p2504_p9 }
 0x416   : > { %s2398_s18 = scalar_lea.hbm %s2503_s25, %s1507_s11  ;;  %p1880_p0 = por %p1879_p1, %p1878_p4 }
 0x417   : > { %p1874_p2 = pneg %p1873_p3 }
 0x419   : > { %p1881_p13 = pnand %p1880_p0, %p1874_p2 }
 0x41b   : > { %1884 = shalt.err (!%p1881_p13)
}
 0x41c   : > { %s2505_s26 = sld [smem:[#allocation22_spill]]  ;;  %p2506_p7 = pmov %p2504_p9 }
 0x422   : > { %s1885_s12 = scalar_lea.hbm %s2505_s26, 128 }
 0x423   : > { %p1886_p5 = scmp.ne.s32.totalorder %s2505_s26, %s1885_s12  ;;  %p1891_p8 = scmp.lt.u32.totalorder %s1885_s12, %s2505_s26 }
 0x425   : > { %p1887_p6 = pnand %p1886_p5, %p2506_p7 }
 0x427   : > { %p1888_p12 = pneg %p1887_p6 }
 0x429   : > { %p1893_p10 = pnand %p1891_p8, %p1888_p12 }
 0x42b   : > { %1896 = shalt.err (!%p1893_p10)
}
 0x42c   : > { %p2507_p9 = pmov %p2506_p7  ;;  %s1897_s20 = scalar_lea.vmem %s1237_s19, 128 }
 0x42d   : > { %p1898_p3 = scmp.ne.s32.totalorder %s1237_s19, %s1897_s20  ;;  %s1985_s27 = smov [#allocation12]  }
 0x42e   : > { %1560 = dma.vmem_to_hbm [thread:$0]  (%p2507_p9), %s1211_s8, 128, %s2505_s26, [#allocation5]  }
 0x42f   : > { %p1899_p2 = pnand %p1898_p3, %p2502_p11  ;;  %s1901_s23 = sshll.u32 %s1985_s27, 4  ;;  %s1902_s23 = int_to_ptr.vmem [resolvable:$false] %s1901_s23 }
 0x430   : > { %s1903_s22 = scalar_lea.vmem %s1902_s23, 256  ;;  %p1904_p1 = scmp.lt.s32.totalorder %s1237_s19, %s1902_s23 }
 0x431   : > { %p1900_p4 = pneg %p1899_p2  ;;  %p1905_p0 = scmp.lt.s32.totalorder %s1903_s22, %s1897_s20 }
 0x433   : > { %p1906_p13 = por %p1905_p0, %p1904_p1 }
 0x435   : > { %p1907_p5 = pnand %p1906_p13, %p1900_p4 }
 0x437   : > { %1910 = shalt.err (!%p1907_p5)
}
 0x438   : > { %s1911_s8 = scalar_lea.hbm %s2398_s18, 128  ;;  %s1915_s12 = scalar_lea.hbm %s2503_s25, 256 }
 0x439   : > { %p1912_p7 = scmp.ne.s32.totalorder %s2398_s18, %s1911_s8  ;;  %p1916_p8 = scmp.lt.u32.totalorder %s2398_s18, %s2503_s25 }
 0x43a   : > { %p1917_p10 = scmp.lt.u32.totalorder %s1915_s12, %s1911_s8  ;;  %p1919_p3 = scmp.lt.u32.totalorder %s1911_s8, %s2398_s18 }
 0x43b   : > { %p1913_p6 = pnand %p1912_p7, %p2502_p11 }
 0x43c   : > { %p1918_p9 = por %p1917_p10, %p1916_p8 }
 0x43d   : > { %p1914_p12 = pneg %p1913_p6 }
 0x43e   : > { %p1920_p2 = por %p1919_p3, %p1918_p9 }
 0x440   : > { %p1921_p4 = pnand %p1920_p2, %p1914_p12 }
 0x442   : > { %1924 = shalt.err (!%p1921_p4)
}
 0x443   : > { %1562 = dma.vmem_to_hbm [thread:$0]  (%p2502_p11), %s1237_s19, 128, %s2398_s18, %s2373_s15  }
 0x444   : > { %p2508_p1 = scmp.eq.s32.totalorder %s2060_s17, 1 }
 0x446   : > { %1950 = dma.done.wait (%p2508_p1), [#allocation5], 128   ;;  %p2509_p0 = pmov %p2508_p1 }
 0x448   : > { %1952 = vsyncadd (%p2509_p0), [#allocation5], 4294967168 }
 0x449 PF: > { %s2510_s30 = sadd.s32 4294967294, %s1971_s16   ;;  %s2511_s10 = sld [smem:[#allocation20_spill]] }
 0x44a   : > { %s1252_s3 = sand.u32 1, %s2510_s30   ;;  %p2513_p5 = scmp.ge.s32.totalorder %s1971_s16, 2 }
 0x44b   : > { %s1253_s28 = scalar_lea.sflag [#allocation11], %s1252_s3 }
 0x44f   : > { %p2512_p13 = scmp.ne.s32.totalorder %s2511_s10, 0 }
 0x451   : > { %p1578_p7 = pnand %p2513_p5, %p2512_p13 }
 0x453   : > { %1954 = dma.done.wait (!%p1578_p7), %s1253_s28, 256  }
 0x454   : > { %1956 = vsyncadd (!%p1578_p7), %s1253_s28, 4294967040  ;;  %s2514_s16 = sld [smem:[#allocation18_spill]]  ;;  %s2515_s24 = sld [smem:[#allocation17_spill]] }
 0x455   : > { %s2516_s15 = sld [smem:[#allocation19_spill]]  ;;  %s2517_s13 = smov %s1963_s14 }
 0x45a   : > { %p28_p11 = scmp.ge.s32.totalorder %s2514_s16, 4   ;;  %s2518_s14 = smov %s2515_s24 }
 0x45c   :  { %30 = sbr.rel (!%p28_p11) target bundleno = 12 (0xc), region = 156 }
 0x463   :  { %1267 = vsyncpa [#allocation4], 1 }
 0x464   :  { %1269 = vsyncpa [#allocation4 + $0x1], 1 }
 0x465   :  { %1270 = vsyncpa [#allocation7], 1 }
 0x466   :  { %1272 = vsyncpa [#allocation7 + $0x1], 1 }
 0x467   :  { %1273 = vsyncpa [#allocation5], 1 }
 0x468   :  { %1275 = vsyncpa [#allocation5 + $0x1], 1 }
 0x469   :  { %1276 = vsyncpa [#allocation11], 1 }
 0x46a   :  { %1278 = vsyncpa [#allocation11 + $0x1], 1 }

</bundles_post_ra>
